<compile_context>
chip_gen: v6e
topology: v6e:2x2x1
jax: 0.10.0
libtpu: 0.0.40
codegen_flags: <defaults>
</compile_context>

<pallas_src>
import jax
import jax.numpy as jnp
import numpy as np
from jax.experimental import pallas as pl
from jax.experimental.pallas import tpu as pltpu


# -----------------------------------------------------------------------------
# Layer-dimension bookkeeping (matches get_encoder / get_decoder)
# -----------------------------------------------------------------------------
def _block_linear_dims(layers, input_dim):
    enc = []
    d_in = input_dim
    for d_out in layers:
        enc.append((d_in, d_out))
        d_in = d_out
    rev = list(reversed(list(layers))) + [input_dim]
    dec = [(rev[i], rev[i + 1]) for i in range(len(rev) - 1)]
    return enc, dec


# -----------------------------------------------------------------------------
# Batch-tile selection: multiple of 8, capped, >=2 grid steps when possible.
# Returns (tile, padded_batch); padded_batch is a multiple of tile.
# -----------------------------------------------------------------------------
def _choose_batch_tile(batch, max_tile=4096):
    b8 = ((batch + 7) // 8) * 8
    if b8 <= 8:
        return 8, 8
    n_steps = max(2, -(-b8 // max_tile))           # >=2 steps (v7x dual-TC)
    bt = ((-(-b8 // n_steps) + 7) // 8) * 8        # round tile up to mult of 8
    b_pad = bt * (-(-b8 // bt))
    return bt, b_pad


# -----------------------------------------------------------------------------
# Fused Pallas kernel: the entire ResidualAE forward in one invocation.
# All tensors inside the kernel are padded to width d_max; zero-padded weight
# rows/cols and biases guarantee padded activation columns stay exactly zero.
# -----------------------------------------------------------------------------
def _make_kernel(n_blocks, n_enc, n_dec, latent_dim, negative_slope=0.01):
    def kernel(x_ref, w_ref, b_ref, out_ref, lat_ref):
        def linear(h, i):
            return (jnp.dot(h, w_ref[i], preferred_element_type=jnp.float32)
                    + b_ref[i])

        x_in = x_ref[...].astype(jnp.float32)
        x_out = None
        idx = 0
        for blk in range(n_blocks):
            if blk > 0:                      # first block adds a zero x_out
                x_in = x_in + x_out
            h = x_in
            # encoder: LeakyReLU after every Linear except the last
            for li in range(n_enc):
                h = linear(h, idx); idx += 1
                if li < n_enc - 1:
                    h = jnp.where(h >= 0, h, negative_slope * h)
            # concatenated latent output, written in-kernel
            lat_ref[:, blk * latent_dim:(blk + 1) * latent_dim] = (
                h[:, :latent_dim].astype(lat_ref.dtype))
            # decoder: ReLU after every Linear except the last
            for li in range(n_dec):
                h = linear(h, idx); idx += 1
                if li < n_dec - 1:
                    h = jnp.maximum(h, 0.0)
            x_out = h
        # transition: Linear + ReLU + Linear applied to (x_in + x_out)
        t = x_in + x_out
        t = jnp.maximum(linear(t, idx), 0.0); idx += 1
        t = linear(t, idx)
        out_ref[...] = t.astype(out_ref.dtype)

    return kernel


# -----------------------------------------------------------------------------
# Wrapper: builds BlockSpecs / grid, packs parameters into two VMEM slabs.
# -----------------------------------------------------------------------------
def make_residual_ae(layers, input_dim, n_blocks, *, max_batch_tile=4096,
                     compute_dtype=jnp.float32):
    layers = tuple(layers)
    enc_dims, dec_dims = _block_linear_dims(layers, input_dim)
    lin_dims = (enc_dims + dec_dims) * n_blocks + [(input_dim, input_dim)] * 2
    latent_dim = layers[-1]
    d_max = max([input_dim] + list(layers))
    n_lin = len(lin_dims)
    kernel = _make_kernel(n_blocks, len(layers), len(layers), latent_dim)

    def pack_params(flat_params):
        """Pack per-layer (w, b) into zero-padded (n_lin,d,d)/(n_lin,1,d) slabs."""
        w = np.zeros((n_lin, d_max, d_max), np.float32)
        b = np.zeros((n_lin, 1, d_max), np.float32)
        for i, (di, do) in enumerate(lin_dims):
            w[i, :di, :do] = np.asarray(flat_params[2 * i], np.float32)
            b[i, 0, :do] = np.asarray(flat_params[2 * i + 1],
                                      np.float32).reshape(-1)
        return (jnp.asarray(w, dtype=compute_dtype),
                jnp.asarray(b, dtype=compute_dtype))

    @jax.jit
    def forward(x, w_slab, b_slab):
        B, D = x.shape
        assert D == input_dim
        bt, b_pad = _choose_batch_tile(B, max_batch_tile)
        xp = x.astype(compute_dtype)
        if b_pad != B or d_max != D:
            xp = jnp.pad(xp, ((0, b_pad - B), (0, d_max - D)))
        grid = (b_pad // bt,)

        in_specs = [
            pl.BlockSpec((bt, d_max), lambda i: (i, 0)),                # x tile
            pl.BlockSpec((n_lin, d_max, d_max), lambda i: (0, 0, 0)),   # W slab
            pl.BlockSpec((n_lin, 1, d_max), lambda i: (0, 0, 0)),       # b slab
        ]
        out_specs = (
            pl.BlockSpec((bt, d_max), lambda i: (i, 0)),
            pl.BlockSpec((bt, n_blocks * latent_dim), lambda i: (i, 0)),
        )
        out_shape = (
            jax.ShapeDtypeStruct((b_pad, d_max), x.dtype),
            jax.ShapeDtypeStruct((b_pad, n_blocks * latent_dim), x.dtype),
        )

        out, lat = pl.pallas_call(
            kernel,
            grid=grid,
            in_specs=in_specs,
            out_specs=out_specs,
            out_shape=out_shape,
            compiler_params=pltpu.CompilerParams(
                dimension_semantics=("parallel",)),
        )(xp, w_slab, b_slab)

        if b_pad != B or d_max != D:
            out = out[:B, :D]
            lat = lat[:B, :]
        return out, lat

    return forward, pack_params


# -----------------------------------------------------------------------------
# Parameter construction (deterministic, mimics nn.Linear default init bounds)
# -----------------------------------------------------------------------------
def _linear_params(key, d_in, d_out):
    k1, k2 = jax.random.split(key)
    bound = 1.0 / np.sqrt(d_in)
    w = jax.random.uniform(k1, (d_in, d_out), jnp.float32, -bound, bound)
    b = jax.random.uniform(k2, (1, d_out), jnp.float32, -bound, bound)
    return w, b


def build_params(key, layers, input_dim, n_blocks):
    enc_dims, dec_dims = _block_linear_dims(layers, input_dim)
    flat = []
    for _ in range(n_blocks):
        for (di, do) in enc_dims + dec_dims:
            key, sub = jax.random.split(key)
            w, b = _linear_params(sub, di, do)
            flat += [w, b]
    for _ in range(2):  # transition: Linear(D,D), Linear(D,D)
        key, sub = jax.random.split(key)
        w, b = _linear_params(sub, input_dim, input_dim)
        flat += [w, b]
    return flat


# -----------------------------------------------------------------------------
# Pure-JAX reference (same math, same param order) for a correctness check
# -----------------------------------------------------------------------------
def reference_forward(x, flat_params, layers, input_dim, n_blocks):
    n_enc = n_dec = len(layers)

    def lin(h, idx, act):
        w, b = flat_params[idx], flat_params[idx + 1]
        y = jnp.dot(h, w, precision=jax.lax.Precision.HIGHEST) + b
        if act == "leaky":
            y = jnp.where(y >= 0, y, 0.01 * y)
        elif act == "relu":
            y = jnp.maximum(y, 0.0)
        return y

    x_in = x
    x_out = jnp.zeros_like(x)
    latents = []
    idx = 0
    for _ in range(n_blocks):
        x_in = x_in + x_out
        h = x_in
        for li in range(n_enc):
            h = lin(h, idx, "leaky" if li < n_enc - 1 else None); idx += 2
        latents.append(h)
        for li in range(n_dec):
            h = lin(h, idx, "relu" if li < n_dec - 1 else None); idx += 2
        x_out = h
    t = x_in + x_out
    t = lin(t, idx, "relu"); idx += 2
    t = lin(t, idx, None)
    return t, jnp.concatenate(latents, axis=-1)


# -----------------------------------------------------------------------------
# Main
# -----------------------------------------------------------------------------
if __name__ == "__main__":
    # TODO(synk): training-mode Dropout (p=0.5 default) not implemented; at
    # inference it is identity, so the eval-mode forward is exact.
    layers = (32, 16, 8)
    input_dim = 32
    n_blocks = 2
    batch = 8

    key = jax.random.PRNGKey(0)
    key, pkey, xkey = jax.random.split(key, 3)
    flat_params = build_params(pkey, layers, input_dim, n_blocks)
    x = jax.random.normal(xkey, (batch, input_dim), dtype=jnp.float32)

    fwd, pack = make_residual_ae(layers, input_dim, n_blocks)
    w_slab, b_slab = pack(flat_params)

    out, latents = fwd(x, w_slab, b_slab)
    out = jax.block_until_ready(out)
    latents = jax.block_until_ready(latents)

    assert out.shape == (batch, input_dim)
    assert latents.shape == (batch, n_blocks * layers[-1])
    assert bool(jnp.all(jnp.isfinite(out)))
    assert bool(jnp.all(jnp.isfinite(latents)))

    ref_out, ref_lat = reference_forward(x, flat_params, layers, input_dim,
                                         n_blocks)
    assert bool(jnp.allclose(out, ref_out, rtol=2e-2, atol=2e-2))
    assert bool(jnp.allclose(latents, ref_lat, rtol=2e-2, atol=2e-2))

    print("KERNEL_OK")
</pallas_src>

<mosaic_0001>
module attributes {stable_mosaic.version = 11 : i64} {
  func.func @kernel(%arg0: i32, %arg1: memref<8x32xf32, #tpu.memory_space<vmem>>, %arg2: memref<14x32x32xf32, #tpu.memory_space<vmem>>, %arg3: memref<14x1x32xf32, #tpu.memory_space<vmem>>, %arg4: memref<8x32xf32, #tpu.memory_space<vmem>>, %arg5: memref<8x16xf32, #tpu.memory_space<vmem>>) attributes {dimension_semantics = [#tpu.dimension_semantics<parallel>], iteration_bounds = array<i64: 1>, scalar_prefetch = 0 : i64, scratch_operands = 0 : i64, tpu.core_type = #tpu.core_type<tc>, window_params = [{transform_indices = @transform_0, window_bounds = array<i64: 8, 32>}, {pipeline_mode = #tpu.pipeline_mode<synchronous>, transform_indices = @transform_1, window_bounds = array<i64: 14, 32, 32>}, {pipeline_mode = #tpu.pipeline_mode<synchronous>, transform_indices = @transform_2, window_bounds = array<i64: 14, 1, 32>}, {transform_indices = @transform_3, window_bounds = array<i64: 8, 32>}, {transform_indices = @transform_4, window_bounds = array<i64: 8, 16>}]} {
    %c0 = arith.constant 0 : index
    %c0_0 = arith.constant 0 : index
    %0 = vector.load %arg1[%c0, %c0_0] : memref<8x32xf32, #tpu.memory_space<vmem>>, vector<8x32xf32>
    %c0_1 = arith.constant 0 : index
    %c0_2 = arith.constant 0 : index
    %c0_3 = arith.constant 0 : index
    %1 = vector.load %arg2[%c0_1, %c0_2, %c0_3] : memref<14x32x32xf32, #tpu.memory_space<vmem>>, vector<1x32x32xf32>
    %2 = vector.shape_cast %1 : vector<1x32x32xf32> to vector<32x32xf32>
    %cst = arith.constant dense<0.000000e+00> : vector<8x32xf32>
    %3 = tpu.matmul %0, %2, %cst {dimension_numbers = #tpu.dot_dimension_numbers<[1], [0], [0], [1], [0, 0, 1, 1], [], []>} : vector<8x32xf32>, vector<32x32xf32>, vector<8x32xf32> -> vector<8x32xf32>
    %c0_4 = arith.constant 0 : index
    %c0_5 = arith.constant 0 : index
    %c0_6 = arith.constant 0 : index
    %4 = vector.load %arg3[%c0_4, %c0_5, %c0_6] : memref<14x1x32xf32, #tpu.memory_space<vmem>>, vector<1x1x32xf32>
    %5 = vector.shape_cast %4 : vector<1x1x32xf32> to vector<1x32xf32>
    %6 = vector.broadcast %5 : vector<1x32xf32> to vector<8x32xf32>
    %7 = arith.addf %3, %6 : vector<8x32xf32>
    %cst_7 = arith.constant 0.000000e+00 : f32
    %8 = vector.broadcast %cst_7 : f32 to vector<8x32xf32>
    %9 = arith.cmpf oge, %7, %8 : vector<8x32xf32>
    %cst_8 = arith.constant 0.00999999977 : f32
    %10 = vector.broadcast %cst_8 : f32 to vector<8x32xf32>
    %11 = arith.mulf %10, %7 : vector<8x32xf32>
    %12 = arith.select %9, %7, %11 : vector<8x32xi1>, vector<8x32xf32>
    %c1 = arith.constant 1 : index
    %c0_9 = arith.constant 0 : index
    %c0_10 = arith.constant 0 : index
    %13 = vector.load %arg2[%c1, %c0_9, %c0_10] : memref<14x32x32xf32, #tpu.memory_space<vmem>>, vector<1x32x32xf32>
    %14 = vector.shape_cast %13 : vector<1x32x32xf32> to vector<32x32xf32>
    %cst_11 = arith.constant dense<0.000000e+00> : vector<8x32xf32>
    %15 = tpu.matmul %12, %14, %cst_11 {dimension_numbers = #tpu.dot_dimension_numbers<[1], [0], [0], [1], [0, 0, 1, 1], [], []>} : vector<8x32xf32>, vector<32x32xf32>, vector<8x32xf32> -> vector<8x32xf32>
    %c1_12 = arith.constant 1 : index
    %c0_13 = arith.constant 0 : index
    %c0_14 = arith.constant 0 : index
    %16 = vector.load %arg3[%c1_12, %c0_13, %c0_14] : memref<14x1x32xf32, #tpu.memory_space<vmem>>, vector<1x1x32xf32>
    %17 = vector.shape_cast %16 : vector<1x1x32xf32> to vector<1x32xf32>
    %18 = vector.broadcast %17 : vector<1x32xf32> to vector<8x32xf32>
    %19 = arith.addf %15, %18 : vector<8x32xf32>
    %cst_15 = arith.constant 0.000000e+00 : f32
    %20 = vector.broadcast %cst_15 : f32 to vector<8x32xf32>
    %21 = arith.cmpf oge, %19, %20 : vector<8x32xf32>
    %cst_16 = arith.constant 0.00999999977 : f32
    %22 = vector.broadcast %cst_16 : f32 to vector<8x32xf32>
    %23 = arith.mulf %22, %19 : vector<8x32xf32>
    %24 = arith.select %21, %19, %23 : vector<8x32xi1>, vector<8x32xf32>
    %c2 = arith.constant 2 : index
    %c0_17 = arith.constant 0 : index
    %c0_18 = arith.constant 0 : index
    %25 = vector.load %arg2[%c2, %c0_17, %c0_18] : memref<14x32x32xf32, #tpu.memory_space<vmem>>, vector<1x32x32xf32>
    %26 = vector.shape_cast %25 : vector<1x32x32xf32> to vector<32x32xf32>
    %cst_19 = arith.constant dense<0.000000e+00> : vector<8x32xf32>
    %27 = tpu.matmul %24, %26, %cst_19 {dimension_numbers = #tpu.dot_dimension_numbers<[1], [0], [0], [1], [0, 0, 1, 1], [], []>} : vector<8x32xf32>, vector<32x32xf32>, vector<8x32xf32> -> vector<8x32xf32>
    %c2_20 = arith.constant 2 : index
    %c0_21 = arith.constant 0 : index
    %c0_22 = arith.constant 0 : index
    %28 = vector.load %arg3[%c2_20, %c0_21, %c0_22] : memref<14x1x32xf32, #tpu.memory_space<vmem>>, vector<1x1x32xf32>
    %29 = vector.shape_cast %28 : vector<1x1x32xf32> to vector<1x32xf32>
    %30 = vector.broadcast %29 : vector<1x32xf32> to vector<8x32xf32>
    %31 = arith.addf %27, %30 : vector<8x32xf32>
    %32 = vector.extract_strided_slice %31 {offsets = [0, 0], sizes = [8, 8], strides = [1, 1]} : vector<8x32xf32> to vector<8x8xf32>
    %c0_23 = arith.constant 0 : index
    %c0_24 = arith.constant 0 : index
    %33 = vector.load %arg5[%c0_23, %c0_24] : memref<8x16xf32, #tpu.memory_space<vmem>>, vector<8x8xf32>
    tpu.vector_store %arg5[%c0_23, %c0_24], %32 {strides = array<i32>} : memref<8x16xf32, #tpu.memory_space<vmem>>, vector<8x8xf32>,
    %c3 = arith.constant 3 : index
    %c0_25 = arith.constant 0 : index
    %c0_26 = arith.constant 0 : index
    %34 = vector.load %arg2[%c3, %c0_25, %c0_26] : memref<14x32x32xf32, #tpu.memory_space<vmem>>, vector<1x32x32xf32>
    %35 = vector.shape_cast %34 : vector<1x32x32xf32> to vector<32x32xf32>
    %cst_27 = arith.constant dense<0.000000e+00> : vector<8x32xf32>
    %36 = tpu.matmul %31, %35, %cst_27 {dimension_numbers = #tpu.dot_dimension_numbers<[1], [0], [0], [1], [0, 0, 1, 1], [], []>} : vector<8x32xf32>, vector<32x32xf32>, vector<8x32xf32> -> vector<8x32xf32>
    %c3_28 = arith.constant 3 : index
    %c0_29 = arith.constant 0 : index
    %c0_30 = arith.constant 0 : index
    %37 = vector.load %arg3[%c3_28, %c0_29, %c0_30] : memref<14x1x32xf32, #tpu.memory_space<vmem>>, vector<1x1x32xf32>
    %38 = vector.shape_cast %37 : vector<1x1x32xf32> to vector<1x32xf32>
    %39 = vector.broadcast %38 : vector<1x32xf32> to vector<8x32xf32>
    %40 = arith.addf %36, %39 : vector<8x32xf32>
    %cst_31 = arith.constant 0.000000e+00 : f32
    %41 = vector.broadcast %cst_31 : f32 to vector<8x32xf32>
    %42 = arith.maximumf %40, %41 : vector<8x32xf32>
    %c4 = arith.constant 4 : index
    %c0_32 = arith.constant 0 : index
    %c0_33 = arith.constant 0 : index
    %43 = vector.load %arg2[%c4, %c0_32, %c0_33] : memref<14x32x32xf32, #tpu.memory_space<vmem>>, vector<1x32x32xf32>
    %44 = vector.shape_cast %43 : vector<1x32x32xf32> to vector<32x32xf32>
    %cst_34 = arith.constant dense<0.000000e+00> : vector<8x32xf32>
    %45 = tpu.matmul %42, %44, %cst_34 {dimension_numbers = #tpu.dot_dimension_numbers<[1], [0], [0], [1], [0, 0, 1, 1], [], []>} : vector<8x32xf32>, vector<32x32xf32>, vector<8x32xf32> -> vector<8x32xf32>
    %c4_35 = arith.constant 4 : index
    %c0_36 = arith.constant 0 : index
    %c0_37 = arith.constant 0 : index
    %46 = vector.load %arg3[%c4_35, %c0_36, %c0_37] : memref<14x1x32xf32, #tpu.memory_space<vmem>>, vector<1x1x32xf32>
    %47 = vector.shape_cast %46 : vector<1x1x32xf32> to vector<1x32xf32>
    %48 = vector.broadcast %47 : vector<1x32xf32> to vector<8x32xf32>
    %49 = arith.addf %45, %48 : vector<8x32xf32>
    %cst_38 = arith.constant 0.000000e+00 : f32
    %50 = vector.broadcast %cst_38 : f32 to vector<8x32xf32>
    %51 = arith.maximumf %49, %50 : vector<8x32xf32>
    %c5 = arith.constant 5 : index
    %c0_39 = arith.constant 0 : index
    %c0_40 = arith.constant 0 : index
    %52 = vector.load %arg2[%c5, %c0_39, %c0_40] : memref<14x32x32xf32, #tpu.memory_space<vmem>>, vector<1x32x32xf32>
    %53 = vector.shape_cast %52 : vector<1x32x32xf32> to vector<32x32xf32>
    %cst_41 = arith.constant dense<0.000000e+00> : vector<8x32xf32>
    %54 = tpu.matmul %51, %53, %cst_41 {dimension_numbers = #tpu.dot_dimension_numbers<[1], [0], [0], [1], [0, 0, 1, 1], [], []>} : vector<8x32xf32>, vector<32x32xf32>, vector<8x32xf32> -> vector<8x32xf32>
    %c5_42 = arith.constant 5 : index
    %c0_43 = arith.constant 0 : index
    %c0_44 = arith.constant 0 : index
    %55 = vector.load %arg3[%c5_42, %c0_43, %c0_44] : memref<14x1x32xf32, #tpu.memory_space<vmem>>, vector<1x1x32xf32>
    %56 = vector.shape_cast %55 : vector<1x1x32xf32> to vector<1x32xf32>
    %57 = vector.broadcast %56 : vector<1x32xf32> to vector<8x32xf32>
    %58 = arith.addf %54, %57 : vector<8x32xf32>
    %59 = arith.addf %0, %58 : vector<8x32xf32>
    %c6 = arith.constant 6 : index
    %c0_45 = arith.constant 0 : index
    %c0_46 = arith.constant 0 : index
    %60 = vector.load %arg2[%c6, %c0_45, %c0_46] : memref<14x32x32xf32, #tpu.memory_space<vmem>>, vector<1x32x32xf32>
    %61 = vector.shape_cast %60 : vector<1x32x32xf32> to vector<32x32xf32>
    %cst_47 = arith.constant dense<0.000000e+00> : vector<8x32xf32>
    %62 = tpu.matmul %59, %61, %cst_47 {dimension_numbers = #tpu.dot_dimension_numbers<[1], [0], [0], [1], [0, 0, 1, 1], [], []>} : vector<8x32xf32>, vector<32x32xf32>, vector<8x32xf32> -> vector<8x32xf32>
    %c6_48 = arith.constant 6 : index
    %c0_49 = arith.constant 0 : index
    %c0_50 = arith.constant 0 : index
    %63 = vector.load %arg3[%c6_48, %c0_49, %c0_50] : memref<14x1x32xf32, #tpu.memory_space<vmem>>, vector<1x1x32xf32>
    %64 = vector.shape_cast %63 : vector<1x1x32xf32> to vector<1x32xf32>
    %65 = vector.broadcast %64 : vector<1x32xf32> to vector<8x32xf32>
    %66 = arith.addf %62, %65 : vector<8x32xf32>
    %cst_51 = arith.constant 0.000000e+00 : f32
    %67 = vector.broadcast %cst_51 : f32 to vector<8x32xf32>
    %68 = arith.cmpf oge, %66, %67 : vector<8x32xf32>
    %cst_52 = arith.constant 0.00999999977 : f32
    %69 = vector.broadcast %cst_52 : f32 to vector<8x32xf32>
    %70 = arith.mulf %69, %66 : vector<8x32xf32>
    %71 = arith.select %68, %66, %70 : vector<8x32xi1>, vector<8x32xf32>
    %c7 = arith.constant 7 : index
    %c0_53 = arith.constant 0 : index
    %c0_54 = arith.constant 0 : index
    %72 = vector.load %arg2[%c7, %c0_53, %c0_54] : memref<14x32x32xf32, #tpu.memory_space<vmem>>, vector<1x32x32xf32>
    %73 = vector.shape_cast %72 : vector<1x32x32xf32> to vector<32x32xf32>
    %cst_55 = arith.constant dense<0.000000e+00> : vector<8x32xf32>
    %74 = tpu.matmul %71, %73, %cst_55 {dimension_numbers = #tpu.dot_dimension_numbers<[1], [0], [0], [1], [0, 0, 1, 1], [], []>} : vector<8x32xf32>, vector<32x32xf32>, vector<8x32xf32> -> vector<8x32xf32>
    %c7_56 = arith.constant 7 : index
    %c0_57 = arith.constant 0 : index
    %c0_58 = arith.constant 0 : index
    %75 = vector.load %arg3[%c7_56, %c0_57, %c0_58] : memref<14x1x32xf32, #tpu.memory_space<vmem>>, vector<1x1x32xf32>
    %76 = vector.shape_cast %75 : vector<1x1x32xf32> to vector<1x32xf32>
    %77 = vector.broadcast %76 : vector<1x32xf32> to vector<8x32xf32>
    %78 = arith.addf %74, %77 : vector<8x32xf32>
    %cst_59 = arith.constant 0.000000e+00 : f32
    %79 = vector.broadcast %cst_59 : f32 to vector<8x32xf32>
    %80 = arith.cmpf oge, %78, %79 : vector<8x32xf32>
    %cst_60 = arith.constant 0.00999999977 : f32
    %81 = vector.broadcast %cst_60 : f32 to vector<8x32xf32>
    %82 = arith.mulf %81, %78 : vector<8x32xf32>
    %83 = arith.select %80, %78, %82 : vector<8x32xi1>, vector<8x32xf32>
    %c8 = arith.constant 8 : index
    %c0_61 = arith.constant 0 : index
    %c0_62 = arith.constant 0 : index
    %84 = vector.load %arg2[%c8, %c0_61, %c0_62] : memref<14x32x32xf32, #tpu.memory_space<vmem>>, vector<1x32x32xf32>
    %85 = vector.shape_cast %84 : vector<1x32x32xf32> to vector<32x32xf32>
    %cst_63 = arith.constant dense<0.000000e+00> : vector<8x32xf32>
    %86 = tpu.matmul %83, %85, %cst_63 {dimension_numbers = #tpu.dot_dimension_numbers<[1], [0], [0], [1], [0, 0, 1, 1], [], []>} : vector<8x32xf32>, vector<32x32xf32>, vector<8x32xf32> -> vector<8x32xf32>
    %c8_64 = arith.constant 8 : index
    %c0_65 = arith.constant 0 : index
    %c0_66 = arith.constant 0 : index
    %87 = vector.load %arg3[%c8_64, %c0_65, %c0_66] : memref<14x1x32xf32, #tpu.memory_space<vmem>>, vector<1x1x32xf32>
    %88 = vector.shape_cast %87 : vector<1x1x32xf32> to vector<1x32xf32>
    %89 = vector.broadcast %88 : vector<1x32xf32> to vector<8x32xf32>
    %90 = arith.addf %86, %89 : vector<8x32xf32>
    %91 = vector.extract_strided_slice %90 {offsets = [0, 0], sizes = [8, 8], strides = [1, 1]} : vector<8x32xf32> to vector<8x8xf32>
    %c0_67 = arith.constant 0 : index
    %c8_68 = arith.constant 8 : index
    %92 = vector.load %arg5[%c0_67, %c8_68] : memref<8x16xf32, #tpu.memory_space<vmem>>, vector<8x8xf32>
    tpu.vector_store %arg5[%c0_67, %c8_68], %91 {strides = array<i32>} : memref<8x16xf32, #tpu.memory_space<vmem>>, vector<8x8xf32>,
    %c9 = arith.constant 9 : index
    %c0_69 = arith.constant 0 : index
    %c0_70 = arith.constant 0 : index
    %93 = vector.load %arg2[%c9, %c0_69, %c0_70] : memref<14x32x32xf32, #tpu.memory_space<vmem>>, vector<1x32x32xf32>
    %94 = vector.shape_cast %93 : vector<1x32x32xf32> to vector<32x32xf32>
    %cst_71 = arith.constant dense<0.000000e+00> : vector<8x32xf32>
    %95 = tpu.matmul %90, %94, %cst_71 {dimension_numbers = #tpu.dot_dimension_numbers<[1], [0], [0], [1], [0, 0, 1, 1], [], []>} : vector<8x32xf32>, vector<32x32xf32>, vector<8x32xf32> -> vector<8x32xf32>
    %c9_72 = arith.constant 9 : index
    %c0_73 = arith.constant 0 : index
    %c0_74 = arith.constant 0 : index
    %96 = vector.load %arg3[%c9_72, %c0_73, %c0_74] : memref<14x1x32xf32, #tpu.memory_space<vmem>>, vector<1x1x32xf32>
    %97 = vector.shape_cast %96 : vector<1x1x32xf32> to vector<1x32xf32>
    %98 = vector.broadcast %97 : vector<1x32xf32> to vector<8x32xf32>
    %99 = arith.addf %95, %98 : vector<8x32xf32>
    %cst_75 = arith.constant 0.000000e+00 : f32
    %100 = vector.broadcast %cst_75 : f32 to vector<8x32xf32>
    %101 = arith.maximumf %99, %100 : vector<8x32xf32>
    %c10 = arith.constant 10 : index
    %c0_76 = arith.constant 0 : index
    %c0_77 = arith.constant 0 : index
    %102 = vector.load %arg2[%c10, %c0_76, %c0_77] : memref<14x32x32xf32, #tpu.memory_space<vmem>>, vector<1x32x32xf32>
    %103 = vector.shape_cast %102 : vector<1x32x32xf32> to vector<32x32xf32>
    %cst_78 = arith.constant dense<0.000000e+00> : vector<8x32xf32>
    %104 = tpu.matmul %101, %103, %cst_78 {dimension_numbers = #tpu.dot_dimension_numbers<[1], [0], [0], [1], [0, 0, 1, 1], [], []>} : vector<8x32xf32>, vector<32x32xf32>, vector<8x32xf32> -> vector<8x32xf32>
    %c10_79 = arith.constant 10 : index
    %c0_80 = arith.constant 0 : index
    %c0_81 = arith.constant 0 : index
    %105 = vector.load %arg3[%c10_79, %c0_80, %c0_81] : memref<14x1x32xf32, #tpu.memory_space<vmem>>, vector<1x1x32xf32>
    %106 = vector.shape_cast %105 : vector<1x1x32xf32> to vector<1x32xf32>
    %107 = vector.broadcast %106 : vector<1x32xf32> to vector<8x32xf32>
    %108 = arith.addf %104, %107 : vector<8x32xf32>
    %cst_82 = arith.constant 0.000000e+00 : f32
    %109 = vector.broadcast %cst_82 : f32 to vector<8x32xf32>
    %110 = arith.maximumf %108, %109 : vector<8x32xf32>
    %c11 = arith.constant 11 : index
    %c0_83 = arith.constant 0 : index
    %c0_84 = arith.constant 0 : index
    %111 = vector.load %arg2[%c11, %c0_83, %c0_84] : memref<14x32x32xf32, #tpu.memory_space<vmem>>, vector<1x32x32xf32>
    %112 = vector.shape_cast %111 : vector<1x32x32xf32> to vector<32x32xf32>
    %cst_85 = arith.constant dense<0.000000e+00> : vector<8x32xf32>
    %113 = tpu.matmul %110, %112, %cst_85 {dimension_numbers = #tpu.dot_dimension_numbers<[1], [0], [0], [1], [0, 0, 1, 1], [], []>} : vector<8x32xf32>, vector<32x32xf32>, vector<8x32xf32> -> vector<8x32xf32>
    %c11_86 = arith.constant 11 : index
    %c0_87 = arith.constant 0 : index
    %c0_88 = arith.constant 0 : index
    %114 = vector.load %arg3[%c11_86, %c0_87, %c0_88] : memref<14x1x32xf32, #tpu.memory_space<vmem>>, vector<1x1x32xf32>
    %115 = vector.shape_cast %114 : vector<1x1x32xf32> to vector<1x32xf32>
    %116 = vector.broadcast %115 : vector<1x32xf32> to vector<8x32xf32>
    %117 = arith.addf %113, %116 : vector<8x32xf32>
    %118 = arith.addf %59, %117 : vector<8x32xf32>
    %c12 = arith.constant 12 : index
    %c0_89 = arith.constant 0 : index
    %c0_90 = arith.constant 0 : index
    %119 = vector.load %arg2[%c12, %c0_89, %c0_90] : memref<14x32x32xf32, #tpu.memory_space<vmem>>, vector<1x32x32xf32>
    %120 = vector.shape_cast %119 : vector<1x32x32xf32> to vector<32x32xf32>
    %cst_91 = arith.constant dense<0.000000e+00> : vector<8x32xf32>
    %121 = tpu.matmul %118, %120, %cst_91 {dimension_numbers = #tpu.dot_dimension_numbers<[1], [0], [0], [1], [0, 0, 1, 1], [], []>} : vector<8x32xf32>, vector<32x32xf32>, vector<8x32xf32> -> vector<8x32xf32>
    %c12_92 = arith.constant 12 : index
    %c0_93 = arith.constant 0 : index
    %c0_94 = arith.constant 0 : index
    %122 = vector.load %arg3[%c12_92, %c0_93, %c0_94] : memref<14x1x32xf32, #tpu.memory_space<vmem>>, vector<1x1x32xf32>
    %123 = vector.shape_cast %122 : vector<1x1x32xf32> to vector<1x32xf32>
    %124 = vector.broadcast %123 : vector<1x32xf32> to vector<8x32xf32>
    %125 = arith.addf %121, %124 : vector<8x32xf32>
    %cst_95 = arith.constant 0.000000e+00 : f32
    %126 = vector.broadcast %cst_95 : f32 to vector<8x32xf32>
    %127 = arith.maximumf %125, %126 : vector<8x32xf32>
    %c13 = arith.constant 13 : index
    %c0_96 = arith.constant 0 : index
    %c0_97 = arith.constant 0 : index
    %128 = vector.load %arg2[%c13, %c0_96, %c0_97] : memref<14x32x32xf32, #tpu.memory_space<vmem>>, vector<1x32x32xf32>
    %129 = vector.shape_cast %128 : vector<1x32x32xf32> to vector<32x32xf32>
    %cst_98 = arith.constant dense<0.000000e+00> : vector<8x32xf32>
    %130 = tpu.matmul %127, %129, %cst_98 {dimension_numbers = #tpu.dot_dimension_numbers<[1], [0], [0], [1], [0, 0, 1, 1], [], []>} : vector<8x32xf32>, vector<32x32xf32>, vector<8x32xf32> -> vector<8x32xf32>
    %c13_99 = arith.constant 13 : index
    %c0_100 = arith.constant 0 : index
    %c0_101 = arith.constant 0 : index
    %131 = vector.load %arg3[%c13_99, %c0_100, %c0_101] : memref<14x1x32xf32, #tpu.memory_space<vmem>>, vector<1x1x32xf32>
    %132 = vector.shape_cast %131 : vector<1x1x32xf32> to vector<1x32xf32>
    %133 = vector.broadcast %132 : vector<1x32xf32> to vector<8x32xf32>
    %134 = arith.addf %130, %133 : vector<8x32xf32>
    %c0_102 = arith.constant 0 : index
    %c0_103 = arith.constant 0 : index
    %135 = vector.load %arg4[%c0_102, %c0_103] : memref<8x32xf32, #tpu.memory_space<vmem>>, vector<8x32xf32>
    tpu.vector_store %arg4[%c0_102, %c0_103], %134 {strides = array<i32>} : memref<8x32xf32, #tpu.memory_space<vmem>>, vector<8x32xf32>,
    return
  }
  func.func @transform_0(%arg0: i32) -> (i32, i32) {
    %c0_i32 = arith.constant 0 : i32
    %c0_i32_0 = arith.constant 0 : i32
    return %arg0, %c0_i32 : i32, i32
  }
  func.func @transform_1(%arg0: i32) -> (i32, i32, i32) {
    %c0_i32 = arith.constant 0 : i32
    %c0_i32_0 = arith.constant 0 : i32
    %c0_i32_1 = arith.constant 0 : i32
    %c0_i32_2 = arith.constant 0 : i32
    return %c0_i32, %c0_i32_0, %c0_i32_1 : i32, i32, i32
  }
  func.func @transform_2(%arg0: i32) -> (i32, i32, i32) {
    %c0_i32 = arith.constant 0 : i32
    %c0_i32_0 = arith.constant 0 : i32
    %c0_i32_1 = arith.constant 0 : i32
    %c0_i32_2 = arith.constant 0 : i32
    return %c0_i32, %c0_i32_0, %c0_i32_1 : i32, i32, i32
  }
  func.func @transform_3(%arg0: i32) -> (i32, i32) {
    %c0_i32 = arith.constant 0 : i32
    %c0_i32_0 = arith.constant 0 : i32
    return %arg0, %c0_i32 : i32, i32
  }
  func.func @transform_4(%arg0: i32) -> (i32, i32) {
    %c0_i32 = arith.constant 0 : i32
    %c0_i32_0 = arith.constant 0 : i32
    return %arg0, %c0_i32 : i32, i32
  }
}

</mosaic_0001>

<bundles_post_ra>
// kernel: forward.1
= control target key start
LH: loop header
LB: loop body
LE: loop exit
PB: predicated region body
PF: predicated region fallthrough
CT: control target
= control target key end

     0   :  { %10 = vsyncpa [#allocation3], 0  ;;  %s1849_s0 = inlined_call_operand.hbm [shape: f32[8,32], index: 0, kind: input, shape index: {}]   ;;  %s1850_s1 = inlined_call_operand.hbm [shape: f32[14,32,32], index: 1, kind: input, shape index: {}]   ;;  %s1851_s2 = inlined_call_operand.hbm [shape: f32[14,1,32], index: 2, kind: input, shape index: {}]   ;;  %s1852_s3 = inlined_call_operand.hbm [shape: f32[8,32], index: 3, kind: output, shape index: {0}]   ;;  %s1853_s4 = inlined_call_operand.hbm [shape: f32[8,16], index: 4, kind: output, shape index: {1}]  }
   0x1   :  { %11 = vsyncpa [#allocation6], 0 }
   0x2   :  { %12 = vsyncpa [#allocation4], 0 }
   0x3   :  { %13 = vsyncpa [#allocation10], 0  ;;  %s1689_s15 = smov [#allocation5]  }
   0x4   :  { %s29_s16 = sshll.u32 %s1689_s15, 4  ;;  %s30_s16 = int_to_ptr.vmem [resolvable:$true] %s29_s16 }
   0x5   :  { %s1589_s17 = scalar_lea.vmem %s30_s16, 7168  ;;  %p1594_p1 = scmp.lt.s32.totalorder %s30_s16, %s30_s16 }
   0x6   :  { %p1590_p0 = scmp.ne.s32.totalorder %s30_s16, %s1589_s17  ;;  %p1595_p2 = scmp.lt.s32.totalorder %s1589_s17, %s1589_s17 }
   0x8   :  { %p1596_p3 = por %p1595_p2, %p1594_p1 }
   0xa   :  { %p1597_p4 = pnand %p1596_p3, %p1590_p0 }
   0xc   :  { %1600 = shalt.err (!%p1597_p4)
}
   0xd   :  { %s1690_s18 = smov 128   ;;  %s1691_s19 = smov 8  }
   0xe   :  { %35 = dma.hbm_to_vmem [thread:$0]  %s1850_s1, 7168, %s30_s16, [#allocation6], %s1690_s18, %s1690_s18, %s1691_s19  }
   0xf   :  { %s1692_s22 = smov [#allocation2]   ;;  %s1693_s24 = smov [#allocation7]  }
  0x10   :  { %s20_s23 = sshll.u32 %s1692_s22, 4  ;;  %s41_s25 = sshll.u32 %s1693_s24, 4  ;;  %s21_s23 = int_to_ptr.vmem [resolvable:$true] %s20_s23  ;;  %s42_s25 = int_to_ptr.vmem [resolvable:$true] %s41_s25 }
  0x11   :  { %s1609_s26 = scalar_lea.vmem %s21_s23, 128  ;;  %p1614_p6 = scmp.lt.s32.totalorder %s21_s23, %s21_s23 }
  0x12   :  { %p1610_p5 = scmp.ne.s32.totalorder %s21_s23, %s1609_s26  ;;  %p1615_p7 = scmp.lt.s32.totalorder %s1609_s26, %s1609_s26 }
  0x14   :  { %p1616_p8 = por %p1615_p7, %p1614_p6 }
  0x16   :  { %p1617_p9 = pnand %p1616_p8, %p1610_p5 }
  0x18   :  { %1620 = shalt.err (!%p1617_p9)
}
  0x19   :  { %23 = dma.hbm_to_vmem [thread:$0]  %s1849_s0, 128, %s21_s23, [#allocation3]  }
  0x1a   :  { %s1629_s29 = scalar_lea.vmem %s42_s25, 224  ;;  %p1634_p11 = scmp.lt.s32.totalorder %s42_s25, %s42_s25 }
  0x1b   :  { %p1630_p10 = scmp.ne.s32.totalorder %s42_s25, %s1629_s29  ;;  %p1635_p12 = scmp.lt.s32.totalorder %s1629_s29, %s1629_s29 }
  0x1d   :  { %p1636_p13 = por %p1635_p12, %p1634_p11 }
  0x1f   :  { %p1637_p0 = pnand %p1636_p13, %p1630_p10 }
  0x21   :  { %1640 = shalt.err (!%p1637_p0)
}
  0x22   :  { %s1694_s1 = smov 16   ;;  %s1695_s30 = smov 1  }
  0x23   :  { %47 = dma.hbm_to_vmem [thread:$0]  %s1851_s2, 224, %s42_s25, [#allocation6], %s1694_s1, %s1694_s1, %s1695_s30  }
  0x24   :  { %1681 = dma.done.wait [#allocation3], 128  }
  0x25   :  { %1682 = vsyncadd [#allocation3], 4294967168 }
  0x26   :  { %1683 = dma.done.wait [#allocation6], 7392  }
  0x27   :  { %1684 = vsyncadd [#allocation6], 4294959904  ;;  %v1696_v0 = vmov 0.0   ;;  %vm1697_vm0 = vmmov 0   ;;  %v61_v1 = vld [vmem:[#allocation5 + $0x18] sm:$0xff]  ;;  %v60_v2 = vld [vmem:[#allocation5 + $0x10] sm:$0xff] }
  0x28   :  { %1416 = vmatprep.subr.mxu0 %v1696_v0  ;;  %1424 = vmatprep.mubr.msk.f32.mxu0 %vm1697_vm0, %v1696_v0  ;;  %v150_v3 = vld [vmem:[#allocation5 + $0x38] sm:$0xff]  ;;  %v59_v4 = vld [vmem:[#allocation5 + $0x8] sm:$0xff]  ;;  %v58_v5 = vld [vmem:[#allocation5] sm:$0xff]  ;;  %vm69_vm1 = vcmask 261120   ;;  %vm321_vm4 = vcmask 64512   ;;  %vm852_vm7 = vcmask 130112  }
  0x29   :  { %1427 = vmatprep.subr.mxu1 %v1696_v0  ;;  %1435 = vmatprep.mubr.msk.f32.mxu1 %vm1697_vm0, %v1696_v0  ;;  %v1744_v6 = vld [vmem:[#allocation2] sm:$0xff]  ;;  %v149_v7 = vld [vmem:[#allocation5 + $0x30] sm:$0xff]  ;;  %v148_v8 = vld [vmem:[#allocation5 + $0x28] sm:$0xff]  ;;  %s1698_s0 = smov [#allocation9]  }
  0x2a   :  { %1417 = vmatpush3.msra.mxu0 %v61_v1  ;;  %1428 = vmatpush3.msra.mxu1 %v150_v3  ;;  %v147_v9 = vld [vmem:[#allocation5 + $0x20] sm:$0xff]  ;;  %v239_v10 = vld [vmem:[#allocation5 + $0x58] sm:$0xff]  ;;  %v238_v17 = vld [vmem:[#allocation5 + $0x50] sm:$0xff]  ;;  %s1304_s2 = sshll.u32 %s1698_s0, 4  ;;  %s1305_s2 = int_to_ptr.vmem [resolvable:$true] %s1304_s2 }
  0x2b   :  { %1418 = vmatprep.subr.mxu0 %v1696_v0  ;;  %1429 = vmatprep.subr.mxu1 %v1696_v0  ;;  %v1318_v11 = vld [vmem:[#allocation7] ss:$0 sm:$0xff]  ;;  %v237_v18 = vld [vmem:[#allocation5 + $0x48] sm:$0xff]  ;;  %v327_v20 = vld [vmem:[#allocation5 + $0x78] sm:$0xff]  ;;  %s1641_s7 = scalar_lea.vmem %s1305_s2, 128  ;;  %p1646_p2 = scmp.lt.s32.totalorder %s1305_s2, %s1305_s2 }
  0x2c   :  { %1419 = vmatpush3.msra.mxu0 %v60_v2  ;;  %1430 = vmatpush3.msra.mxu1 %v149_v7  ;;  %v236_v19 = vld [vmem:[#allocation5 + $0x40] sm:$0xff]  ;;  %v326_v21 = vld [vmem:[#allocation5 + $0x70] sm:$0xff]  ;;  %v325_v28 = vld [vmem:[#allocation5 + $0x68] sm:$0xff]  ;;  %p1642_p1 = scmp.ne.s32.totalorder %s1305_s2, %s1641_s7  ;;  %p1647_p3 = scmp.lt.s32.totalorder %s1641_s7, %s1641_s7 }
  0x2d   :  { %1420 = vmatprep.subr.mxu0 %v1696_v0  ;;  %1431 = vmatprep.subr.mxu1 %v1696_v0  ;;  %v1320_v22 = vld [vmem:[#allocation7 + $0x1] ss:$0 sm:$0xff]  ;;  %v414_v30 = vld [vmem:[#allocation5 + $0x98] sm:$0xff]  ;;  %v1322_v31 = vld [vmem:[#allocation7 + $0x2] ss:$0 sm:$0xff] }
  0x2e   :  { %1421 = vmatpush3.msra.mxu0 %v59_v4  ;;  %1432 = vmatpush3.msra.mxu1 %v148_v8  ;;  %v324_v29 = vld [vmem:[#allocation5 + $0x60] sm:$0xff]  ;;  %v413_v35 = vld [vmem:[#allocation5 + $0x90] sm:$0xff]  ;;  %v412_v36 = vld [vmem:[#allocation5 + $0x88] sm:$0xff]  ;;  %p1648_p4 = por %p1647_p3, %p1646_p2 }
  0x2f   :  { %1422 = vmatprep.subr.mxu0 %v1696_v0  ;;  %1433 = vmatprep.subr.mxu1 %v1696_v0  ;;  %v411_v37 = vld [vmem:[#allocation5 + $0x80] sm:$0xff]  ;;  %v501_v38 = vld [vmem:[#allocation5 + $0xb8] sm:$0xff]  ;;  %v500_v44 = vld [vmem:[#allocation5 + $0xb0] sm:$0xff] }
  0x30   :  { %1423 = vmatpush3.msra.mxu0 %v58_v5  ;;  %1434 = vmatpush3.msra.mxu1 %v147_v9  ;;  %v1324_v39 = vld [vmem:[#allocation7 + $0x3] ss:$0 sm:$0xff]  ;;  %v499_v45 = vld [vmem:[#allocation5 + $0xa8] sm:$0xff]  ;;  %v588_v47 = vld [vmem:[#allocation5 + $0xd8] sm:$0xff]  ;;  %p1649_p5 = pnand %p1648_p4, %p1642_p1 }
  0x31   :  { %1425 = vmatmul.mubr.msk.f32.vlgmr.msra.gmra.mxu0 %vm69_vm1, %v1744_v6  ;;  %1438 = vmatprep.subr.mxu0 %v1696_v0  ;;  %v498_v46 = vld [vmem:[#allocation5 + $0xa0] sm:$0xff]  ;;  %v587_v53 = vld [vmem:[#allocation5 + $0xd0] sm:$0xff]  ;;  %v586_v54 = vld [vmem:[#allocation5 + $0xc8] sm:$0xff] }
  0x32   :  { %1446 = vmatprep.mubr.msk.f32.mxu0 %vm1697_vm0, %v1696_v0  ;;  %1449 = vmatprep.subr.mxu1 %v1696_v0  ;;  %v1326_v48 = vld [vmem:[#allocation7 + $0x4] ss:$0 sm:$0xff]  ;;  %v677_v56 = vld [vmem:[#allocation5 + $0xf8] sm:$0xff]  ;;  %v1328_v57 = vld [vmem:[#allocation7 + $0x5] ss:$0 sm:$0xff] }
  0x33   :  { %1439 = vmatpush3.msra.mxu0 %v239_v10  ;;  %v585_v55 = vld [vmem:[#allocation5 + $0xc0] sm:$0xff]  ;;  %v676_v62 = vld [vmem:[#allocation5 + $0xf0] sm:$0xff]  ;;  %v675_v63 = vld [vmem:[#allocation5 + $0xe8] sm:$0xff] }
  0x34   :  { %1440 = vmatprep.subr.mxu0 %v1696_v0  ;;  %v674_v1 = vld [vmem:[#allocation5 + $0xe0] sm:$0xff]  ;;  %v766_v2 = vld [vmem:[#allocation5 + $0x118] sm:$0xff]  ;;  %v765_v9 = vld [vmem:[#allocation5 + $0x110] sm:$0xff] }
  0x35   :  { %1441 = vmatpush3.msra.mxu0 %v238_v17  ;;  %v1330_v3 = vld [vmem:[#allocation7 + $0x6] ss:$0 sm:$0xff]  ;;  %v764_v10 = vld [vmem:[#allocation5 + $0x108] sm:$0xff] }
  0x36   :  { %1442 = vmatprep.subr.mxu0 %v1696_v0 }
  0x37   :  { %1443 = vmatpush3.msra.mxu0 %v237_v18 }
  0x38   :  { %1444 = vmatprep.subr.mxu0 %v1696_v0 }
  0x39   :  { %1445 = vmatpush3.msra.mxu0 %v236_v19 }
  0x3a   :  { %1460 = vmatprep.subr.mxu0 %v1696_v0 }
  0xf1   :  { %v139_v12 = vpop.f32.mrf.mxu0 }
  0xf2   :  { %v140_v13 = vadd.f32 %v1318_v11, %v139_v12  ;;  %v763_v11 = vld [vmem:[#allocation5 + $0x100] sm:$0xff]  ;;  %v858_v12 = vld [vmem:[#allocation5 + $0x138] sm:$0xff] }
  0xf3   :  { %v1426_v14 = vpop.f32.mrf.mxu0 }
  0xf4   :  { %vm143_vm2 = vcmp.ge.f32.partialorder %v140_v13, 0.0  ;;  %v144_v15 = vmul.f32 0.01, %v140_v13  ;;  %v1332_v14 = vld [vmem:[#allocation7 + $0x7] ss:$0 sm:$0xff] }
  0xf6   :  { %v145_v16 = vsel %vm143_vm2, %v140_v13, %v144_v15  ;;  %v857_v13 = vld [vmem:[#allocation5 + $0x130] sm:$0xff] }
  0xf7   :  { %1436 = vmatmul.mubr.msk.f32.vlgmr.msra.gmra.mxu1 %vm69_vm1, %v145_v16 }
  0xf8   :  { %1457 = vmatprep.mubr.msk.f32.mxu1 %vm1697_vm0, %v1696_v0  ;;  %1450 = vmatpush3.msra.mxu1 %v327_v20  ;;  %v856_v20 = vld [vmem:[#allocation5 + $0x128] sm:$0xff] }
  0xf9   :  { %1451 = vmatprep.subr.mxu1 %v1696_v0 }
  0xfa   :  { %1452 = vmatpush3.msra.mxu1 %v326_v21  ;;  %v855_v21 = vld [vmem:[#allocation5 + $0x120] sm:$0xff] }
  0xfb   :  { %1453 = vmatprep.subr.mxu1 %v1696_v0 }
  0xfc   :  { %1454 = vmatpush3.msra.mxu1 %v325_v28  ;;  %v942_v28 = vld [vmem:[#allocation5 + $0x148] sm:$0xff] }
  0xfd   :  { %1455 = vmatprep.subr.mxu1 %v1696_v0 }
  0xfe   :  { %1456 = vmatpush3.msra.mxu1 %v324_v29  ;;  %v941_v29 = vld [vmem:[#allocation5 + $0x140] sm:$0xff] }
  0xff   :  { %1471 = vmatprep.subr.mxu1 %v1696_v0 }
 0x1b7   :  { %v228_v23 = vpop.f32.mrf.mxu1 }
 0x1b8   :  { %v229_v24 = vadd.f32 %v1320_v22, %v228_v23  ;;  %v944_v22 = vld [vmem:[#allocation5 + $0x158] sm:$0xff]  ;;  %v1334_v23 = vld [vmem:[#allocation7 + $0x8] ss:$0 sm:$0xff] }
 0x1b9   :  { %v1437_v25 = vpop.f32.mrf.mxu1 }
 0x1ba   :  { %vm232_vm3 = vcmp.ge.f32.partialorder %v229_v24, 0.0  ;;  %v233_v26 = vmul.f32 0.01, %v229_v24 }
 0x1bc   :  { %v234_v27 = vsel %vm232_vm3, %v229_v24, %v233_v26 }
 0x1bd   :  { %1447 = vmatmul.mubr.msk.f32.vlgmr.msra.gmra.mxu0 %vm69_vm1, %v234_v27  ;;  %v943_v27 = vld [vmem:[#allocation5 + $0x150] sm:$0xff] }
 0x1be   :  { %1468 = vmatprep.mubr.msk.f32.mxu0 %vm1697_vm0, %v1696_v0  ;;  %1461 = vmatpush3.msra.mxu0 %v414_v30  ;;  %v1031_v30 = vld [vmem:[#allocation5 + $0x178] sm:$0xff] }
 0x1bf   :  { %1462 = vmatprep.subr.mxu0 %v1696_v0 }
 0x1c0   :  { %1463 = vmatpush3.msra.mxu0 %v413_v35 }
 0x1c1   :  { %1464 = vmatprep.subr.mxu0 %v1696_v0 }
 0x1c2   :  { %1465 = vmatpush3.msra.mxu0 %v412_v36 }
 0x1c3   :  { %1466 = vmatprep.subr.mxu0 %v1696_v0 }
 0x1c4   :  { %1467 = vmatpush3.msra.mxu0 %v411_v37  ;;  %v1030_v37 = vld [vmem:[#allocation5 + $0x170] sm:$0xff] }
 0x1c5   :  { %1482 = vmatprep.subr.mxu0 %v1696_v0 }
 0x27d   :  { %v317_v32 = vpop.f32.mrf.mxu0 }
 0x27e   :  { %v318_v33 = vadd.f32 %v1322_v31, %v317_v32  ;;  %v1336_v32 = vld [vmem:[#allocation7 + $0x9] ss:$0 sm:$0xff] }
 0x27f   :  { %v1448_v34 = vpop.f32.mrf.mxu0 }
 0x280   :  { %322 = vst.msk [vmem:[#allocation9] sm:$0xff] %vm321_vm4, %v318_v33  ;;  %1458 = vmatmul.mubr.msk.f32.vlgmr.msra.gmra.mxu1 %vm69_vm1, %v318_v33 }
 0x281   :  { %1479 = vmatprep.mubr.msk.f32.mxu1 %vm1697_vm0, %v1696_v0  ;;  %1472 = vmatpush3.msra.mxu1 %v501_v38  ;;  %v1029_v38 = vld [vmem:[#allocation5 + $0x168] sm:$0xff] }
 0x282   :  { %1473 = vmatprep.subr.mxu1 %v1696_v0 }
 0x283   :  { %1474 = vmatpush3.msra.mxu1 %v500_v44 }
 0x284   :  { %1475 = vmatprep.subr.mxu1 %v1696_v0 }
 0x285   :  { %1476 = vmatpush3.msra.mxu1 %v499_v45 }
 0x286   :  { %1477 = vmatprep.subr.mxu1 %v1696_v0 }
 0x287   :  { %1478 = vmatpush3.msra.mxu1 %v498_v46  ;;  %v1117_v46 = vld [vmem:[#allocation5 + $0x190] sm:$0xff] }
 0x288   :  { %1493 = vmatprep.subr.mxu1 %v1696_v0 }
 0x340   :  { %v405_v40 = vpop.f32.mrf.mxu1 }
 0x341   :  { %v406_v41 = vadd.f32 %v1324_v39, %v405_v40  ;;  %v1028_v39 = vld [vmem:[#allocation5 + $0x160] sm:$0xff]  ;;  %v1118_v40 = vld [vmem:[#allocation5 + $0x198] sm:$0xff] }
 0x342   :  { %v1459_v42 = vpop.f32.mrf.mxu1 }
 0x343   :  { %v409_v43 = vmax.f32 %v406_v41, 0.0  ;;  %v1338_v41 = vld [vmem:[#allocation7 + $0xa] ss:$0 sm:$0xff] }
 0x345   :  { %1469 = vmatmul.mubr.msk.f32.vlgmr.msra.gmra.mxu0 %vm69_vm1, %v409_v43 }
 0x346   :  { %1490 = vmatprep.mubr.msk.f32.mxu0 %vm1697_vm0, %v1696_v0  ;;  %1483 = vmatpush3.msra.mxu0 %v588_v47  ;;  %v1116_v47 = vld [vmem:[#allocation5 + $0x188] sm:$0xff] }
 0x347   :  { %1484 = vmatprep.subr.mxu0 %v1696_v0 }
 0x348   :  { %1485 = vmatpush3.msra.mxu0 %v587_v53 }
 0x349   :  { %1486 = vmatprep.subr.mxu0 %v1696_v0 }
 0x34a   :  { %1487 = vmatpush3.msra.mxu0 %v586_v54 }
 0x34b   :  { %1488 = vmatprep.subr.mxu0 %v1696_v0 }
 0x34c   :  { %1489 = vmatpush3.msra.mxu0 %v585_v55  ;;  %v1204_v55 = vld [vmem:[#allocation5 + $0x1b0] sm:$0xff] }
 0x34d   :  { %1504 = vmatprep.subr.mxu0 %v1696_v0 }
 0x405   :  { %v492_v49 = vpop.f32.mrf.mxu0 }
 0x406   :  { %v493_v50 = vadd.f32 %v1326_v48, %v492_v49  ;;  %v1115_v48 = vld [vmem:[#allocation5 + $0x180] sm:$0xff]  ;;  %v1205_v49 = vld [vmem:[#allocation5 + $0x1b8] sm:$0xff] }
 0x407   :  { %v1470_v51 = vpop.f32.mrf.mxu0 }
 0x408   :  { %v496_v52 = vmax.f32 %v493_v50, 0.0  ;;  %v1340_v50 = vld [vmem:[#allocation7 + $0xb] ss:$0 sm:$0xff] }
 0x40a   :  { %1480 = vmatmul.mubr.msk.f32.vlgmr.msra.gmra.mxu1 %vm69_vm1, %v496_v52 }
 0x40b   :  { %1501 = vmatprep.mubr.msk.f32.mxu1 %vm1697_vm0, %v1696_v0  ;;  %1494 = vmatpush3.msra.mxu1 %v677_v56  ;;  %v1203_v56 = vld [vmem:[#allocation5 + $0x1a8] sm:$0xff] }
 0x40c   :  { %1495 = vmatprep.subr.mxu1 %v1696_v0 }
 0x40d   :  { %1496 = vmatpush3.msra.mxu1 %v676_v62 }
 0x40e   :  { %1497 = vmatprep.subr.mxu1 %v1696_v0 }
 0x40f   :  { %1498 = vmatpush3.msra.mxu1 %v675_v63 }
 0x410   :  { %1499 = vmatprep.subr.mxu1 %v1696_v0 }
 0x411   :  { %1500 = vmatpush3.msra.mxu1 %v674_v1 }
 0x412   :  { %1515 = vmatprep.subr.mxu1 %v1696_v0 }
 0x4ca   :  { %v579_v58 = vpop.f32.mrf.mxu1 }
 0x4cb   :  { %v580_v59 = vadd.f32 %v1328_v57, %v579_v58  ;;  %v1202_v57 = vld [vmem:[#allocation5 + $0x1a0] sm:$0xff]  ;;  %v1342_v58 = vld [vmem:[#allocation7 + $0xc] ss:$0 sm:$0xff] }
 0x4cc   :  { %v1481_v60 = vpop.f32.mrf.mxu1 }
 0x4cd   :  { %v1792_v61 = vadd.f32 %v580_v59, %v1744_v6 }
 0x4cf   :  { %1491 = vmatmul.mubr.msk.f32.vlgmr.msra.gmra.mxu0 %vm69_vm1, %v1792_v61 }
 0x4d0   :  { %1512 = vmatprep.mubr.msk.f32.mxu0 %vm1697_vm0, %v1696_v0  ;;  %1505 = vmatpush3.msra.mxu0 %v766_v2 }
 0x4d1   :  { %1506 = vmatprep.subr.mxu0 %v1696_v0 }
 0x4d2   :  { %1507 = vmatpush3.msra.mxu0 %v765_v9 }
 0x4d3   :  { %1508 = vmatprep.subr.mxu0 %v1696_v0 }
 0x4d4   :  { %1509 = vmatpush3.msra.mxu0 %v764_v10 }
 0x4d5   :  { %1510 = vmatprep.subr.mxu0 %v1696_v0 }
 0x4d6   :  { %1511 = vmatpush3.msra.mxu0 %v763_v11 }
 0x4d7   :  { %1526 = vmatprep.subr.mxu0 %v1696_v0 }
 0x58f   :  { %v666_v4 = vpop.f32.mrf.mxu0 }
 0x590   :  { %v667_v5 = vadd.f32 %v1330_v3, %v666_v4 }
 0x591   :  { %v1492_v6 = vpop.f32.mrf.mxu0 }
 0x592   :  { %vm670_vm5 = vcmp.ge.f32.partialorder %v667_v5, 0.0  ;;  %v671_v7 = vmul.f32 0.01, %v667_v5 }
 0x594   :  { %v672_v8 = vsel %vm670_vm5, %v667_v5, %v671_v7 }
 0x595   :  { %1502 = vmatmul.mubr.msk.f32.vlgmr.msra.gmra.mxu1 %vm69_vm1, %v672_v8 }
 0x596   :  { %1523 = vmatprep.mubr.msk.f32.mxu1 %vm1697_vm0, %v1696_v0  ;;  %1516 = vmatpush3.msra.mxu1 %v858_v12 }
 0x597   :  { %1517 = vmatprep.subr.mxu1 %v1696_v0 }
 0x598   :  { %1518 = vmatpush3.msra.mxu1 %v857_v13 }
 0x599   :  { %1519 = vmatprep.subr.mxu1 %v1696_v0 }
 0x59a   :  { %1520 = vmatpush3.msra.mxu1 %v856_v20 }
 0x59b   :  { %1521 = vmatprep.subr.mxu1 %v1696_v0 }
 0x59c   :  { %1522 = vmatpush3.msra.mxu1 %v855_v21 }
 0x59d   :  { %1537 = vmatprep.subr.mxu1 %v1696_v0 }
 0x655   :  { %v755_v15 = vpop.f32.mrf.mxu1 }
 0x656   :  { %v756_v16 = vadd.f32 %v1332_v14, %v755_v15 }
 0x657   :  { %v1503_v17 = vpop.f32.mrf.mxu1 }
 0x658   :  { %vm759_vm6 = vcmp.ge.f32.partialorder %v756_v16, 0.0  ;;  %v760_v18 = vmul.f32 0.01, %v756_v16 }
 0x65a   :  { %v761_v19 = vsel %vm759_vm6, %v756_v16, %v760_v18 }
 0x65b   :  { %1513 = vmatmul.mubr.msk.f32.vlgmr.msra.gmra.mxu0 %vm69_vm1, %v761_v19 }
 0x65c   :  { %1534 = vmatprep.mubr.msk.f32.mxu0 %vm1697_vm0, %v1696_v0  ;;  %1527 = vmatpush3.msra.mxu0 %v944_v22 }
 0x65d   :  { %1528 = vmatprep.subr.mxu0 %v1696_v0 }
 0x65e   :  { %1529 = vmatpush3.msra.mxu0 %v943_v27 }
 0x65f   :  { %1530 = vmatprep.subr.mxu0 %v1696_v0 }
 0x660   :  { %1531 = vmatpush3.msra.mxu0 %v942_v28 }
 0x661   :  { %1532 = vmatprep.subr.mxu0 %v1696_v0 }
 0x662   :  { %1533 = vmatpush3.msra.mxu0 %v941_v29 }
 0x663   :  { %1548 = vmatprep.subr.mxu0 %v1696_v0 }
 0x71b   :  { %v844_v24 = vpop.f32.mrf.mxu0 }
 0x71c   :  { %v845_v25 = vadd.f32 %v1334_v23, %v844_v24 }
 0x71d   :  { %v1514_v26 = vpop.f32.mrf.mxu0 }
 0x71e   :  { %849 = vrot.lane.b32.xlu0 %v845_v25, %s1691_s19  ;;  %1524 = vmatmul.mubr.msk.f32.vlgmr.msra.gmra.mxu1 %vm69_vm1, %v845_v25 }
 0x71f   :  { %1545 = vmatprep.mubr.msk.f32.mxu1 %vm1697_vm0, %v1696_v0  ;;  %1538 = vmatpush3.msra.mxu1 %v1031_v30 }
 0x720   :  { %1539 = vmatprep.subr.mxu1 %v1696_v0 }
 0x721   :  { %1540 = vmatpush3.msra.mxu1 %v1030_v37 }
 0x722   :  { %1541 = vmatprep.subr.mxu1 %v1696_v0 }
 0x723   :  { %1542 = vmatpush3.msra.mxu1 %v1029_v38 }
 0x724   :  { %1543 = vmatprep.subr.mxu1 %v1696_v0 }
 0x725   :  { %1544 = vmatpush3.msra.mxu1 %v1028_v39 }
 0x726   :  { %1559 = vmatprep.subr.mxu1 %v1696_v0 }
 0x790   :  { %v850_v31 = vpop.permute.xlu0 %849 }
 0x791   :  { %853 = vst.msk [vmem:[#allocation9] sm:$0xff] %vm852_vm7, %v850_v31 }
 0x7de   :  { %v935_v33 = vpop.f32.mrf.mxu1 }
 0x7df   :  { %v936_v34 = vadd.f32 %v1336_v32, %v935_v33 }
 0x7e0   :  { %v1525_v35 = vpop.f32.mrf.mxu1 }
 0x7e1   :  { %v939_v36 = vmax.f32 %v936_v34, 0.0 }
 0x7e3   :  { %1535 = vmatmul.mubr.msk.f32.vlgmr.msra.gmra.mxu0 %vm69_vm1, %v939_v36 }
 0x7e4   :  { %1556 = vmatprep.mubr.msk.f32.mxu0 %vm1697_vm0, %v1696_v0  ;;  %1549 = vmatpush3.msra.mxu0 %v1118_v40 }
 0x7e5   :  { %1550 = vmatprep.subr.mxu0 %v1696_v0 }
 0x7e6   :  { %1551 = vmatpush3.msra.mxu0 %v1117_v46 }
 0x7e7   :  { %1552 = vmatprep.subr.mxu0 %v1696_v0 }
 0x7e8   :  { %1553 = vmatpush3.msra.mxu0 %v1116_v47 }
 0x7e9   :  { %1554 = vmatprep.subr.mxu0 %v1696_v0 }
 0x7ea   :  { %1555 = vmatpush3.msra.mxu0 %v1115_v48 }
 0x8a3   :  { %v1022_v42 = vpop.f32.mrf.mxu0 }
 0x8a4   :  { %v1023_v43 = vadd.f32 %v1338_v41, %v1022_v42 }
 0x8a5   :  { %v1536_v44 = vpop.f32.mrf.mxu0 }
 0x8a6   :  { %v1026_v45 = vmax.f32 %v1023_v43, 0.0 }
 0x8a8   :  { %1546 = vmatmul.mubr.msk.f32.vlgmr.msra.gmra.mxu1 %vm69_vm1, %v1026_v45 }
 0x8a9   :  { %1567 = vmatprep.mubr.msk.f32.mxu1 %vm1697_vm0, %v1696_v0  ;;  %1560 = vmatpush3.msra.mxu1 %v1205_v49 }
 0x8aa   :  { %1561 = vmatprep.subr.mxu1 %v1696_v0 }
 0x8ab   :  { %1562 = vmatpush3.msra.mxu1 %v1204_v55 }
 0x8ac   :  { %1563 = vmatprep.subr.mxu1 %v1696_v0 }
 0x8ad   :  { %1564 = vmatpush3.msra.mxu1 %v1203_v56 }
 0x8ae   :  { %1565 = vmatprep.subr.mxu1 %v1696_v0 }
 0x8af   :  { %1566 = vmatpush3.msra.mxu1 %v1202_v57 }
 0x968   :  { %v1109_v51 = vpop.f32.mrf.mxu1 }
 0x969   :  { %v1110_v52 = vadd.f32 %v1340_v50, %v1109_v51 }
 0x96a   :  { %v1547_v53 = vpop.f32.mrf.mxu1 }
 0x96b   :  { %v1113_v54 = vadd.f32 %v1110_v52, %v1792_v61 }
 0x96d   :  { %1557 = vmatmul.mubr.msk.f32.vlgmr.msra.gmra.mxu0 %vm69_vm1, %v1113_v54 }
 0xa2d   :  { %v1196_v59 = vpop.f32.mrf.mxu0 }
 0xa2e   :  { %v1197_v60 = vadd.f32 %v1342_v58, %v1196_v59 }
 0xa2f   :  { %v1558_v62 = vpop.f32.mrf.mxu0 }
 0xa30   :  { %v1200_v63 = vmax.f32 %v1197_v60, 0.0 }
 0xa32   :  { %1568 = vmatmul.mubr.msk.f32.vlgmr.msra.gmra.mxu1 %vm69_vm1, %v1200_v63 }
 0xa33   :  { %1652 = shalt.err (!%p1649_p5)
}
 0xa34   :  { %1307 = dma.vmem_to_hbm [thread:$0]  %s1305_s2, 128, %s1853_s4, [#allocation10]   ;;  %v1344_v0 = vld [vmem:[#allocation7 + $0xd] ss:$0 sm:$0xff] }
 0xa35   :  { %s1699_s10 = smov [#allocation8]  }
 0xa36   :  { %s1294_s11 = sshll.u32 %s1699_s10, 4  ;;  %s1295_s11 = int_to_ptr.vmem [resolvable:$true] %s1294_s11 }
 0xa37   :  { %s1661_s12 = scalar_lea.vmem %s1295_s11, 128  ;;  %p1666_p7 = scmp.lt.s32.totalorder %s1295_s11, %s1295_s11 }
 0xa38   :  { %p1662_p6 = scmp.ne.s32.totalorder %s1295_s11, %s1661_s12  ;;  %p1667_p8 = scmp.lt.s32.totalorder %s1661_s12, %s1661_s12 }
 0xa3a   :  { %p1668_p9 = por %p1667_p8, %p1666_p7 }
 0xa3c   :  { %p1669_p10 = pnand %p1668_p9, %p1662_p6 }
 0xaf2   :  { %v1283_v61 = vpop.f32.mrf.mxu1 }
 0xaf3   :  { %v1284_v1 = vadd.f32 %v1344_v0, %v1283_v61 }
 0xaf4   :  { %v1569_v2 = vpop.f32.mrf.mxu1 }
 0xaf5   :  { %1287 = vst.msk [vmem:[#allocation8] sm:$0xff] %vm69_vm1, %v1284_v1 }
 0xaf6   :  { %1672 = shalt.err (!%p1669_p10)
}
 0xaf7   :  { %1297 = dma.vmem_to_hbm [thread:$0]  %s1295_s11, 128, %s1852_s3, [#allocation4]  }
 0xaf8   :  { %1685 = dma.done.wait [#allocation4], 128  }
 0xaf9   :  { %1686 = vsyncadd [#allocation4], 4294967168 }
 0xafa   :  { %1687 = dma.done.wait [#allocation10], 128  }
 0xafb   :  { %1688 = vsyncadd [#allocation10], 4294967168 }
 0xafc   :  { %1314 = vsyncpa [#allocation3], 1 }
 0xafd   :  { %1315 = vsyncpa [#allocation6], 1 }
 0xafe   :  { %1316 = vsyncpa [#allocation4], 1 }
 0xaff   :  { %1317 = vsyncpa [#allocation10], 1 }

</bundles_post_ra>
